<compile_context>
chip_gen: v6e
topology: v6e:2x2x1
jax: 0.10.0
libtpu: 0.0.40
codegen_flags: <defaults>
</compile_context>

<pallas_src>
import functools
import math

import jax
import jax.numpy as jnp
from jax.experimental import pallas as pl
from jax.experimental.pallas import tpu as pltpu


# ----------------------------------------------------------------------------
# Pallas kernel: fused 3x3 conv (padding=1, stride=1) + bias + optional ReLU
# ----------------------------------------------------------------------------
def _conv3x3_kernel(x_ref, w_ref, b_ref, o_ref, *, H, W, relu):
    """Per grid step = one image.

    x_ref : (1, Cin, Lp)   bf16, Lp = (H+3)*(W+2), zero-padded + row-flattened
    w_ref : (9, Cout, Cin) bf16, tap index t = dy*3 + dx
    b_ref : (Cout, 1)      f32
    o_ref : (1, Cout, L)   out dtype, L = H*(W+2) (2 junk lanes per image row,
                           stripped by the wrapper)
    """
    Wp = W + 2
    L = H * Wp
    acc = None
    for t in range(9):                           # unrolled at trace time
        dy, dx = divmod(t, 3)
        off = dy * Wp + dx                       # static lane offset of this tap
        xs = x_ref[0, :, off:off + L]            # (Cin, L)  bf16
        wt = w_ref[t]                            # (Cout, Cin) bf16
        part = jnp.dot(wt, xs, preferred_element_type=jnp.float32)  # (Cout, L) f32
        acc = part if acc is None else acc + part
    y = acc + b_ref[...]                         # (Cout,1) broadcast over lanes
    if relu:
        y = jnp.maximum(y, 0.0)
    o_ref[0] = y.astype(o_ref.dtype)


def conv3x3(x_nchw, wmat, bias, *, relu=True, out_dtype=jnp.float32):
    """x_nchw: (B, Cin, H, W); wmat: (9, Cout, Cin) bf16; bias: (Cout, 1) f32."""
    B, Cin, H, W = x_nchw.shape
    assert wmat.shape[0] == 9 and wmat.shape[2] == Cin
    Cout = wmat.shape[1]
    Wp = W + 2
    Lp = (H + 3) * Wp          # 1 top pad row, 2 bottom pad rows (tap overrun slack)
    L = H * Wp

    # One cheap pad+cast pass (vs. the 9x f32 im2col this replaces).
    xp = jnp.pad(x_nchw.astype(jnp.bfloat16), ((0, 0), (0, 0), (1, 2), (1, 1)))
    xf = xp.reshape(B, Cin, Lp)                  # contiguous reshape

    out_flat = pl.pallas_call(
        functools.partial(_conv3x3_kernel, H=H, W=W, relu=relu),
        out_shape=jax.ShapeDtypeStruct((B, Cout, L), out_dtype),
        grid_spec=pltpu.PrefetchScalarGridSpec(
            num_scalar_prefetch=0,
            grid=(B,),
            in_specs=[
                pl.BlockSpec((1, Cin, Lp), lambda b: (b, 0, 0)),    # one image
                pl.BlockSpec((9, Cout, Cin), lambda b: (0, 0, 0)),  # all taps (resident)
                pl.BlockSpec((Cout, 1), lambda b: (0, 0)),          # bias (resident)
            ],
            out_specs=pl.BlockSpec((1, Cout, L), lambda b: (b, 0, 0)),
        ),
        compiler_params=pltpu.CompilerParams(
            dimension_semantics=("parallel",),
            vmem_limit_bytes=32 * 1024 * 1024,
        ),
    )(xf, wmat, bias)

    # Strip the 2 junk lanes per image row -> plain NCHW.
    return out_flat.reshape(B, Cout, H, Wp)[:, :, :, :W]


# ----------------------------------------------------------------------------
# DoubleConv module: param prep (done once) + forward
# ----------------------------------------------------------------------------
def prepare_double_conv_params(w1, b1, w2, b2):
    """Fold all weight-layout work into init: torch (Cout,Cin,3,3) -> (9,Cout,Cin) bf16."""
    def prep(w, b):
        cout, cin = w.shape[0], w.shape[1]
        wmat = jnp.transpose(w, (2, 3, 0, 1)).reshape(9, cout, cin).astype(jnp.bfloat16)
        return wmat, b.reshape(cout, 1).astype(jnp.float32)

    wm1, bm1 = prep(w1, b1)
    wm2, bm2 = prep(w2, b2)
    return {"w1": wm1, "b1": bm1, "w2": wm2, "b2": bm2}


def double_conv_forward(params, x_nchw):
    h = conv3x3(x_nchw, params["w1"], params["b1"], relu=True, out_dtype=jnp.bfloat16)
    return conv3x3(h, params["w2"], params["b2"], relu=True, out_dtype=jnp.float32)


# ----------------------------------------------------------------------------
# Pure-JAX f32 reference (for a tolerance check only)
# ----------------------------------------------------------------------------
def _reference_double_conv(x, w1, b1, w2, b2):
    def conv(v, w, b):
        y = jax.lax.conv_general_dilated(
            v, w, window_strides=(1, 1), padding=((1, 1), (1, 1)),
            dimension_numbers=("NCHW", "OIHW", "NCHW"))
        return jnp.maximum(y + b[None, :, None, None], 0.0)

    return conv(conv(x, w1, b1), w2, b2)


# ----------------------------------------------------------------------------
if __name__ == "__main__":
    B, Cin, Cout, H, W = 2, 4, 8, 16, 16

    key = jax.random.PRNGKey(0)
    kx, kw1, kb1, kw2, kb2 = jax.random.split(key, 5)
    x = jax.random.normal(kx, (B, Cin, H, W), jnp.float32)
    w1 = jax.random.normal(kw1, (Cout, Cin, 3, 3), jnp.float32) / math.sqrt(Cin * 9)
    b1 = 0.1 * jax.random.normal(kb1, (Cout,), jnp.float32)
    w2 = jax.random.normal(kw2, (Cout, Cout, 3, 3), jnp.float32) / math.sqrt(Cout * 9)
    b2 = 0.1 * jax.random.normal(kb2, (Cout,), jnp.float32)

    params = prepare_double_conv_params(w1, b1, w2, b2)

    fwd = jax.jit(double_conv_forward)
    out = fwd(params, x)
    jax.block_until_ready(out)

    assert out.shape == (B, Cout, H, W), out.shape
    assert bool(jnp.all(jnp.isfinite(out)))

    ref = _reference_double_conv(x, w1, b1, w2, b2)
    max_err = float(jnp.max(jnp.abs(out.astype(jnp.float32) - ref)))
    # bf16 operands / f32 accumulation: loose tolerance vs the f32 reference.
    assert max_err < 1e-1, f"max abs error vs f32 reference too large: {max_err}"

    print("KERNEL_OK")
</pallas_src>

<mosaic_0001>
module attributes {stable_mosaic.version = 11 : i64} {
  func.func @_conv3x3_kernel(%arg0: i32, %arg1: memref<1x4x342xbf16, #tpu.memory_space<vmem>>, %arg2: memref<9x8x4xbf16, #tpu.memory_space<vmem>>, %arg3: memref<8x1xf32, #tpu.memory_space<vmem>>, %arg4: memref<1x8x288xbf16, #tpu.memory_space<vmem>>) attributes {dimension_semantics = [#tpu.dimension_semantics<parallel>], iteration_bounds = array<i64: 2>, scalar_prefetch = 0 : i64, scratch_operands = 0 : i64, tpu.core_type = #tpu.core_type<tc>, window_params = [{transform_indices = @transform_0, window_bounds = array<i64: 1, 4, 342>}, {pipeline_mode = #tpu.pipeline_mode<synchronous>, transform_indices = @transform_1, window_bounds = array<i64: 9, 8, 4>}, {pipeline_mode = #tpu.pipeline_mode<synchronous>, transform_indices = @transform_2, window_bounds = array<i64: 8, 1>}, {transform_indices = @transform_3, window_bounds = array<i64: 1, 8, 288>}]} {
    %c0 = arith.constant 0 : index
    %c0_0 = arith.constant 0 : index
    %c0_1 = arith.constant 0 : index
    %0 = vector.load %arg1[%c0, %c0_0, %c0_1] : memref<1x4x342xbf16, #tpu.memory_space<vmem>>, vector<1x4x288xbf16>
    %1 = vector.shape_cast %0 : vector<1x4x288xbf16> to vector<4x288xbf16>
    %c0_2 = arith.constant 0 : index
    %c0_3 = arith.constant 0 : index
    %c0_4 = arith.constant 0 : index
    %2 = vector.load %arg2[%c0_2, %c0_3, %c0_4] : memref<9x8x4xbf16, #tpu.memory_space<vmem>>, vector<1x8x4xbf16>
    %3 = vector.shape_cast %2 : vector<1x8x4xbf16> to vector<8x4xbf16>
    %cst = arith.constant dense<0.000000e+00> : vector<8x288xf32>
    %4 = tpu.matmul %3, %1, %cst {dimension_numbers = #tpu.dot_dimension_numbers<[1], [0], [0], [1], [0, 0, 1, 1], [], []>} : vector<8x4xbf16>, vector<4x288xbf16>, vector<8x288xf32> -> vector<8x288xf32>
    %c0_5 = arith.constant 0 : index
    %c0_6 = arith.constant 0 : index
    %c1 = arith.constant 1 : index
    %5 = vector.load %arg1[%c0_5, %c0_6, %c1] : memref<1x4x342xbf16, #tpu.memory_space<vmem>>, vector<1x4x288xbf16>
    %6 = vector.shape_cast %5 : vector<1x4x288xbf16> to vector<4x288xbf16>
    %c1_7 = arith.constant 1 : index
    %c0_8 = arith.constant 0 : index
    %c0_9 = arith.constant 0 : index
    %7 = vector.load %arg2[%c1_7, %c0_8, %c0_9] : memref<9x8x4xbf16, #tpu.memory_space<vmem>>, vector<1x8x4xbf16>
    %8 = vector.shape_cast %7 : vector<1x8x4xbf16> to vector<8x4xbf16>
    %cst_10 = arith.constant dense<0.000000e+00> : vector<8x288xf32>
    %9 = tpu.matmul %8, %6, %cst_10 {dimension_numbers = #tpu.dot_dimension_numbers<[1], [0], [0], [1], [0, 0, 1, 1], [], []>} : vector<8x4xbf16>, vector<4x288xbf16>, vector<8x288xf32> -> vector<8x288xf32>
    %10 = arith.addf %4, %9 : vector<8x288xf32>
    %c0_11 = arith.constant 0 : index
    %c0_12 = arith.constant 0 : index
    %c2 = arith.constant 2 : index
    %11 = vector.load %arg1[%c0_11, %c0_12, %c2] : memref<1x4x342xbf16, #tpu.memory_space<vmem>>, vector<1x4x288xbf16>
    %12 = vector.shape_cast %11 : vector<1x4x288xbf16> to vector<4x288xbf16>
    %c2_13 = arith.constant 2 : index
    %c0_14 = arith.constant 0 : index
    %c0_15 = arith.constant 0 : index
    %13 = vector.load %arg2[%c2_13, %c0_14, %c0_15] : memref<9x8x4xbf16, #tpu.memory_space<vmem>>, vector<1x8x4xbf16>
    %14 = vector.shape_cast %13 : vector<1x8x4xbf16> to vector<8x4xbf16>
    %cst_16 = arith.constant dense<0.000000e+00> : vector<8x288xf32>
    %15 = tpu.matmul %14, %12, %cst_16 {dimension_numbers = #tpu.dot_dimension_numbers<[1], [0], [0], [1], [0, 0, 1, 1], [], []>} : vector<8x4xbf16>, vector<4x288xbf16>, vector<8x288xf32> -> vector<8x288xf32>
    %16 = arith.addf %10, %15 : vector<8x288xf32>
    %c0_17 = arith.constant 0 : index
    %c0_18 = arith.constant 0 : index
    %c18 = arith.constant 18 : index
    %17 = vector.load %arg1[%c0_17, %c0_18, %c18] : memref<1x4x342xbf16, #tpu.memory_space<vmem>>, vector<1x4x288xbf16>
    %18 = vector.shape_cast %17 : vector<1x4x288xbf16> to vector<4x288xbf16>
    %c3 = arith.constant 3 : index
    %c0_19 = arith.constant 0 : index
    %c0_20 = arith.constant 0 : index
    %19 = vector.load %arg2[%c3, %c0_19, %c0_20] : memref<9x8x4xbf16, #tpu.memory_space<vmem>>, vector<1x8x4xbf16>
    %20 = vector.shape_cast %19 : vector<1x8x4xbf16> to vector<8x4xbf16>
    %cst_21 = arith.constant dense<0.000000e+00> : vector<8x288xf32>
    %21 = tpu.matmul %20, %18, %cst_21 {dimension_numbers = #tpu.dot_dimension_numbers<[1], [0], [0], [1], [0, 0, 1, 1], [], []>} : vector<8x4xbf16>, vector<4x288xbf16>, vector<8x288xf32> -> vector<8x288xf32>
    %22 = arith.addf %16, %21 : vector<8x288xf32>
    %c0_22 = arith.constant 0 : index
    %c0_23 = arith.constant 0 : index
    %c19 = arith.constant 19 : index
    %23 = vector.load %arg1[%c0_22, %c0_23, %c19] : memref<1x4x342xbf16, #tpu.memory_space<vmem>>, vector<1x4x288xbf16>
    %24 = vector.shape_cast %23 : vector<1x4x288xbf16> to vector<4x288xbf16>
    %c4 = arith.constant 4 : index
    %c0_24 = arith.constant 0 : index
    %c0_25 = arith.constant 0 : index
    %25 = vector.load %arg2[%c4, %c0_24, %c0_25] : memref<9x8x4xbf16, #tpu.memory_space<vmem>>, vector<1x8x4xbf16>
    %26 = vector.shape_cast %25 : vector<1x8x4xbf16> to vector<8x4xbf16>
    %cst_26 = arith.constant dense<0.000000e+00> : vector<8x288xf32>
    %27 = tpu.matmul %26, %24, %cst_26 {dimension_numbers = #tpu.dot_dimension_numbers<[1], [0], [0], [1], [0, 0, 1, 1], [], []>} : vector<8x4xbf16>, vector<4x288xbf16>, vector<8x288xf32> -> vector<8x288xf32>
    %28 = arith.addf %22, %27 : vector<8x288xf32>
    %c0_27 = arith.constant 0 : index
    %c0_28 = arith.constant 0 : index
    %c20 = arith.constant 20 : index
    %29 = vector.load %arg1[%c0_27, %c0_28, %c20] : memref<1x4x342xbf16, #tpu.memory_space<vmem>>, vector<1x4x288xbf16>
    %30 = vector.shape_cast %29 : vector<1x4x288xbf16> to vector<4x288xbf16>
    %c5 = arith.constant 5 : index
    %c0_29 = arith.constant 0 : index
    %c0_30 = arith.constant 0 : index
    %31 = vector.load %arg2[%c5, %c0_29, %c0_30] : memref<9x8x4xbf16, #tpu.memory_space<vmem>>, vector<1x8x4xbf16>
    %32 = vector.shape_cast %31 : vector<1x8x4xbf16> to vector<8x4xbf16>
    %cst_31 = arith.constant dense<0.000000e+00> : vector<8x288xf32>
    %33 = tpu.matmul %32, %30, %cst_31 {dimension_numbers = #tpu.dot_dimension_numbers<[1], [0], [0], [1], [0, 0, 1, 1], [], []>} : vector<8x4xbf16>, vector<4x288xbf16>, vector<8x288xf32> -> vector<8x288xf32>
    %34 = arith.addf %28, %33 : vector<8x288xf32>
    %c0_32 = arith.constant 0 : index
    %c0_33 = arith.constant 0 : index
    %c36 = arith.constant 36 : index
    %35 = vector.load %arg1[%c0_32, %c0_33, %c36] : memref<1x4x342xbf16, #tpu.memory_space<vmem>>, vector<1x4x288xbf16>
    %36 = vector.shape_cast %35 : vector<1x4x288xbf16> to vector<4x288xbf16>
    %c6 = arith.constant 6 : index
    %c0_34 = arith.constant 0 : index
    %c0_35 = arith.constant 0 : index
    %37 = vector.load %arg2[%c6, %c0_34, %c0_35] : memref<9x8x4xbf16, #tpu.memory_space<vmem>>, vector<1x8x4xbf16>
    %38 = vector.shape_cast %37 : vector<1x8x4xbf16> to vector<8x4xbf16>
    %cst_36 = arith.constant dense<0.000000e+00> : vector<8x288xf32>
    %39 = tpu.matmul %38, %36, %cst_36 {dimension_numbers = #tpu.dot_dimension_numbers<[1], [0], [0], [1], [0, 0, 1, 1], [], []>} : vector<8x4xbf16>, vector<4x288xbf16>, vector<8x288xf32> -> vector<8x288xf32>
    %40 = arith.addf %34, %39 : vector<8x288xf32>
    %c0_37 = arith.constant 0 : index
    %c0_38 = arith.constant 0 : index
    %c37 = arith.constant 37 : index
    %41 = vector.load %arg1[%c0_37, %c0_38, %c37] : memref<1x4x342xbf16, #tpu.memory_space<vmem>>, vector<1x4x288xbf16>
    %42 = vector.shape_cast %41 : vector<1x4x288xbf16> to vector<4x288xbf16>
    %c7 = arith.constant 7 : index
    %c0_39 = arith.constant 0 : index
    %c0_40 = arith.constant 0 : index
    %43 = vector.load %arg2[%c7, %c0_39, %c0_40] : memref<9x8x4xbf16, #tpu.memory_space<vmem>>, vector<1x8x4xbf16>
    %44 = vector.shape_cast %43 : vector<1x8x4xbf16> to vector<8x4xbf16>
    %cst_41 = arith.constant dense<0.000000e+00> : vector<8x288xf32>
    %45 = tpu.matmul %44, %42, %cst_41 {dimension_numbers = #tpu.dot_dimension_numbers<[1], [0], [0], [1], [0, 0, 1, 1], [], []>} : vector<8x4xbf16>, vector<4x288xbf16>, vector<8x288xf32> -> vector<8x288xf32>
    %46 = arith.addf %40, %45 : vector<8x288xf32>
    %c0_42 = arith.constant 0 : index
    %c0_43 = arith.constant 0 : index
    %c38 = arith.constant 38 : index
    %47 = vector.load %arg1[%c0_42, %c0_43, %c38] : memref<1x4x342xbf16, #tpu.memory_space<vmem>>, vector<1x4x288xbf16>
    %48 = vector.shape_cast %47 : vector<1x4x288xbf16> to vector<4x288xbf16>
    %c8 = arith.constant 8 : index
    %c0_44 = arith.constant 0 : index
    %c0_45 = arith.constant 0 : index
    %49 = vector.load %arg2[%c8, %c0_44, %c0_45] : memref<9x8x4xbf16, #tpu.memory_space<vmem>>, vector<1x8x4xbf16>
    %50 = vector.shape_cast %49 : vector<1x8x4xbf16> to vector<8x4xbf16>
    %cst_46 = arith.constant dense<0.000000e+00> : vector<8x288xf32>
    %51 = tpu.matmul %50, %48, %cst_46 {dimension_numbers = #tpu.dot_dimension_numbers<[1], [0], [0], [1], [0, 0, 1, 1], [], []>} : vector<8x4xbf16>, vector<4x288xbf16>, vector<8x288xf32> -> vector<8x288xf32>
    %52 = arith.addf %46, %51 : vector<8x288xf32>
    %c0_47 = arith.constant 0 : index
    %c0_48 = arith.constant 0 : index
    %53 = vector.load %arg3[%c0_47, %c0_48] : memref<8x1xf32, #tpu.memory_space<vmem>>, vector<8x1xf32>
    %54 = vector.broadcast %53 : vector<8x1xf32> to vector<8x288xf32>
    %55 = arith.addf %52, %54 : vector<8x288xf32>
    %cst_49 = arith.constant 0.000000e+00 : f32
    %56 = vector.broadcast %cst_49 : f32 to vector<8x288xf32>
    %57 = arith.maximumf %55, %56 : vector<8x288xf32>
    %58 = arith.truncf %57 : vector<8x288xf32> to vector<8x288xbf16>
    %c0_50 = arith.constant 0 : index
    %c0_51 = arith.constant 0 : index
    %c0_52 = arith.constant 0 : index
    %59 = vector.load %arg4[%c0_50, %c0_51, %c0_52] : memref<1x8x288xbf16, #tpu.memory_space<vmem>>, vector<1x8x288xbf16>
    %60 = vector.shape_cast %59 : vector<1x8x288xbf16> to vector<8x288xbf16>
    %61 = vector.shape_cast %58 : vector<8x288xbf16> to vector<1x8x288xbf16>
    tpu.vector_store %arg4[%c0_50, %c0_51, %c0_52], %61 {strides = array<i32>} : memref<1x8x288xbf16, #tpu.memory_space<vmem>>, vector<1x8x288xbf16>,
    return
  }
  func.func @transform_0(%arg0: i32) -> (i32, i32, i32) {
    %c0_i32 = arith.constant 0 : i32
    %c0_i32_0 = arith.constant 0 : i32
    %c0_i32_1 = arith.constant 0 : i32
    return %arg0, %c0_i32, %c0_i32_0 : i32, i32, i32
  }
  func.func @transform_1(%arg0: i32) -> (i32, i32, i32) {
    %c0_i32 = arith.constant 0 : i32
    %c0_i32_0 = arith.constant 0 : i32
    %c0_i32_1 = arith.constant 0 : i32
    %c0_i32_2 = arith.constant 0 : i32
    return %c0_i32, %c0_i32_0, %c0_i32_1 : i32, i32, i32
  }
  func.func @transform_2(%arg0: i32) -> (i32, i32) {
    %c0_i32 = arith.constant 0 : i32
    %c0_i32_0 = arith.constant 0 : i32
    %c0_i32_1 = arith.constant 0 : i32
    return %c0_i32, %c0_i32_0 : i32, i32
  }
  func.func @transform_3(%arg0: i32) -> (i32, i32, i32) {
    %c0_i32 = arith.constant 0 : i32
    %c0_i32_0 = arith.constant 0 : i32
    %c0_i32_1 = arith.constant 0 : i32
    return %arg0, %c0_i32, %c0_i32_0 : i32, i32, i32
  }
}

module attributes {stable_mosaic.version = 11 : i64} {
  func.func @_conv3x3_kernel(%arg0: i32, %arg1: memref<1x8x342xbf16, #tpu.memory_space<vmem>>, %arg2: memref<9x8x8xbf16, #tpu.memory_space<vmem>>, %arg3: memref<8x1xf32, #tpu.memory_space<vmem>>, %arg4: memref<1x8x288xf32, #tpu.memory_space<vmem>>) attributes {dimension_semantics = [#tpu.dimension_semantics<parallel>], iteration_bounds = array<i64: 2>, scalar_prefetch = 0 : i64, scratch_operands = 0 : i64, tpu.core_type = #tpu.core_type<tc>, window_params = [{transform_indices = @transform_0, window_bounds = array<i64: 1, 8, 342>}, {pipeline_mode = #tpu.pipeline_mode<synchronous>, transform_indices = @transform_1, window_bounds = array<i64: 9, 8, 8>}, {pipeline_mode = #tpu.pipeline_mode<synchronous>, transform_indices = @transform_2, window_bounds = array<i64: 8, 1>}, {transform_indices = @transform_3, window_bounds = array<i64: 1, 8, 288>}]} {
    %c0 = arith.constant 0 : index
    %c0_0 = arith.constant 0 : index
    %c0_1 = arith.constant 0 : index
    %0 = vector.load %arg1[%c0, %c0_0, %c0_1] : memref<1x8x342xbf16, #tpu.memory_space<vmem>>, vector<1x8x288xbf16>
    %1 = vector.shape_cast %0 : vector<1x8x288xbf16> to vector<8x288xbf16>
    %c0_2 = arith.constant 0 : index
    %c0_3 = arith.constant 0 : index
    %c0_4 = arith.constant 0 : index
    %2 = vector.load %arg2[%c0_2, %c0_3, %c0_4] : memref<9x8x8xbf16, #tpu.memory_space<vmem>>, vector<1x8x8xbf16>
    %3 = vector.shape_cast %2 : vector<1x8x8xbf16> to vector<8x8xbf16>
    %cst = arith.constant dense<0.000000e+00> : vector<8x288xf32>
    %4 = tpu.matmul %3, %1, %cst {dimension_numbers = #tpu.dot_dimension_numbers<[1], [0], [0], [1], [0, 0, 1, 1], [], []>} : vector<8x8xbf16>, vector<8x288xbf16>, vector<8x288xf32> -> vector<8x288xf32>
    %c0_5 = arith.constant 0 : index
    %c0_6 = arith.constant 0 : index
    %c1 = arith.constant 1 : index
    %5 = vector.load %arg1[%c0_5, %c0_6, %c1] : memref<1x8x342xbf16, #tpu.memory_space<vmem>>, vector<1x8x288xbf16>
    %6 = vector.shape_cast %5 : vector<1x8x288xbf16> to vector<8x288xbf16>
    %c1_7 = arith.constant 1 : index
    %c0_8 = arith.constant 0 : index
    %c0_9 = arith.constant 0 : index
    %7 = vector.load %arg2[%c1_7, %c0_8, %c0_9] : memref<9x8x8xbf16, #tpu.memory_space<vmem>>, vector<1x8x8xbf16>
    %8 = vector.shape_cast %7 : vector<1x8x8xbf16> to vector<8x8xbf16>
    %cst_10 = arith.constant dense<0.000000e+00> : vector<8x288xf32>
    %9 = tpu.matmul %8, %6, %cst_10 {dimension_numbers = #tpu.dot_dimension_numbers<[1], [0], [0], [1], [0, 0, 1, 1], [], []>} : vector<8x8xbf16>, vector<8x288xbf16>, vector<8x288xf32> -> vector<8x288xf32>
    %10 = arith.addf %4, %9 : vector<8x288xf32>
    %c0_11 = arith.constant 0 : index
    %c0_12 = arith.constant 0 : index
    %c2 = arith.constant 2 : index
    %11 = vector.load %arg1[%c0_11, %c0_12, %c2] : memref<1x8x342xbf16, #tpu.memory_space<vmem>>, vector<1x8x288xbf16>
    %12 = vector.shape_cast %11 : vector<1x8x288xbf16> to vector<8x288xbf16>
    %c2_13 = arith.constant 2 : index
    %c0_14 = arith.constant 0 : index
    %c0_15 = arith.constant 0 : index
    %13 = vector.load %arg2[%c2_13, %c0_14, %c0_15] : memref<9x8x8xbf16, #tpu.memory_space<vmem>>, vector<1x8x8xbf16>
    %14 = vector.shape_cast %13 : vector<1x8x8xbf16> to vector<8x8xbf16>
    %cst_16 = arith.constant dense<0.000000e+00> : vector<8x288xf32>
    %15 = tpu.matmul %14, %12, %cst_16 {dimension_numbers = #tpu.dot_dimension_numbers<[1], [0], [0], [1], [0, 0, 1, 1], [], []>} : vector<8x8xbf16>, vector<8x288xbf16>, vector<8x288xf32> -> vector<8x288xf32>
    %16 = arith.addf %10, %15 : vector<8x288xf32>
    %c0_17 = arith.constant 0 : index
    %c0_18 = arith.constant 0 : index
    %c18 = arith.constant 18 : index
    %17 = vector.load %arg1[%c0_17, %c0_18, %c18] : memref<1x8x342xbf16, #tpu.memory_space<vmem>>, vector<1x8x288xbf16>
    %18 = vector.shape_cast %17 : vector<1x8x288xbf16> to vector<8x288xbf16>
    %c3 = arith.constant 3 : index
    %c0_19 = arith.constant 0 : index
    %c0_20 = arith.constant 0 : index
    %19 = vector.load %arg2[%c3, %c0_19, %c0_20] : memref<9x8x8xbf16, #tpu.memory_space<vmem>>, vector<1x8x8xbf16>
    %20 = vector.shape_cast %19 : vector<1x8x8xbf16> to vector<8x8xbf16>
    %cst_21 = arith.constant dense<0.000000e+00> : vector<8x288xf32>
    %21 = tpu.matmul %20, %18, %cst_21 {dimension_numbers = #tpu.dot_dimension_numbers<[1], [0], [0], [1], [0, 0, 1, 1], [], []>} : vector<8x8xbf16>, vector<8x288xbf16>, vector<8x288xf32> -> vector<8x288xf32>
    %22 = arith.addf %16, %21 : vector<8x288xf32>
    %c0_22 = arith.constant 0 : index
    %c0_23 = arith.constant 0 : index
    %c19 = arith.constant 19 : index
    %23 = vector.load %arg1[%c0_22, %c0_23, %c19] : memref<1x8x342xbf16, #tpu.memory_space<vmem>>, vector<1x8x288xbf16>
    %24 = vector.shape_cast %23 : vector<1x8x288xbf16> to vector<8x288xbf16>
    %c4 = arith.constant 4 : index
    %c0_24 = arith.constant 0 : index
    %c0_25 = arith.constant 0 : index
    %25 = vector.load %arg2[%c4, %c0_24, %c0_25] : memref<9x8x8xbf16, #tpu.memory_space<vmem>>, vector<1x8x8xbf16>
    %26 = vector.shape_cast %25 : vector<1x8x8xbf16> to vector<8x8xbf16>
    %cst_26 = arith.constant dense<0.000000e+00> : vector<8x288xf32>
    %27 = tpu.matmul %26, %24, %cst_26 {dimension_numbers = #tpu.dot_dimension_numbers<[1], [0], [0], [1], [0, 0, 1, 1], [], []>} : vector<8x8xbf16>, vector<8x288xbf16>, vector<8x288xf32> -> vector<8x288xf32>
    %28 = arith.addf %22, %27 : vector<8x288xf32>
    %c0_27 = arith.constant 0 : index
    %c0_28 = arith.constant 0 : index
    %c20 = arith.constant 20 : index
    %29 = vector.load %arg1[%c0_27, %c0_28, %c20] : memref<1x8x342xbf16, #tpu.memory_space<vmem>>, vector<1x8x288xbf16>
    %30 = vector.shape_cast %29 : vector<1x8x288xbf16> to vector<8x288xbf16>
    %c5 = arith.constant 5 : index
    %c0_29 = arith.constant 0 : index
    %c0_30 = arith.constant 0 : index
    %31 = vector.load %arg2[%c5, %c0_29, %c0_30] : memref<9x8x8xbf16, #tpu.memory_space<vmem>>, vector<1x8x8xbf16>
    %32 = vector.shape_cast %31 : vector<1x8x8xbf16> to vector<8x8xbf16>
    %cst_31 = arith.constant dense<0.000000e+00> : vector<8x288xf32>
    %33 = tpu.matmul %32, %30, %cst_31 {dimension_numbers = #tpu.dot_dimension_numbers<[1], [0], [0], [1], [0, 0, 1, 1], [], []>} : vector<8x8xbf16>, vector<8x288xbf16>, vector<8x288xf32> -> vector<8x288xf32>
    %34 = arith.addf %28, %33 : vector<8x288xf32>
    %c0_32 = arith.constant 0 : index
    %c0_33 = arith.constant 0 : index
    %c36 = arith.constant 36 : index
    %35 = vector.load %arg1[%c0_32, %c0_33, %c36] : memref<1x8x342xbf16, #tpu.memory_space<vmem>>, vector<1x8x288xbf16>
    %36 = vector.shape_cast %35 : vector<1x8x288xbf16> to vector<8x288xbf16>
    %c6 = arith.constant 6 : index
    %c0_34 = arith.constant 0 : index
    %c0_35 = arith.constant 0 : index
    %37 = vector.load %arg2[%c6, %c0_34, %c0_35] : memref<9x8x8xbf16, #tpu.memory_space<vmem>>, vector<1x8x8xbf16>
    %38 = vector.shape_cast %37 : vector<1x8x8xbf16> to vector<8x8xbf16>
    %cst_36 = arith.constant dense<0.000000e+00> : vector<8x288xf32>
    %39 = tpu.matmul %38, %36, %cst_36 {dimension_numbers = #tpu.dot_dimension_numbers<[1], [0], [0], [1], [0, 0, 1, 1], [], []>} : vector<8x8xbf16>, vector<8x288xbf16>, vector<8x288xf32> -> vector<8x288xf32>
    %40 = arith.addf %34, %39 : vector<8x288xf32>
    %c0_37 = arith.constant 0 : index
    %c0_38 = arith.constant 0 : index
    %c37 = arith.constant 37 : index
    %41 = vector.load %arg1[%c0_37, %c0_38, %c37] : memref<1x8x342xbf16, #tpu.memory_space<vmem>>, vector<1x8x288xbf16>
    %42 = vector.shape_cast %41 : vector<1x8x288xbf16> to vector<8x288xbf16>
    %c7 = arith.constant 7 : index
    %c0_39 = arith.constant 0 : index
    %c0_40 = arith.constant 0 : index
    %43 = vector.load %arg2[%c7, %c0_39, %c0_40] : memref<9x8x8xbf16, #tpu.memory_space<vmem>>, vector<1x8x8xbf16>
    %44 = vector.shape_cast %43 : vector<1x8x8xbf16> to vector<8x8xbf16>
    %cst_41 = arith.constant dense<0.000000e+00> : vector<8x288xf32>
    %45 = tpu.matmul %44, %42, %cst_41 {dimension_numbers = #tpu.dot_dimension_numbers<[1], [0], [0], [1], [0, 0, 1, 1], [], []>} : vector<8x8xbf16>, vector<8x288xbf16>, vector<8x288xf32> -> vector<8x288xf32>
    %46 = arith.addf %40, %45 : vector<8x288xf32>
    %c0_42 = arith.constant 0 : index
    %c0_43 = arith.constant 0 : index
    %c38 = arith.constant 38 : index
    %47 = vector.load %arg1[%c0_42, %c0_43, %c38] : memref<1x8x342xbf16, #tpu.memory_space<vmem>>, vector<1x8x288xbf16>
    %48 = vector.shape_cast %47 : vector<1x8x288xbf16> to vector<8x288xbf16>
    %c8 = arith.constant 8 : index
    %c0_44 = arith.constant 0 : index
    %c0_45 = arith.constant 0 : index
    %49 = vector.load %arg2[%c8, %c0_44, %c0_45] : memref<9x8x8xbf16, #tpu.memory_space<vmem>>, vector<1x8x8xbf16>
    %50 = vector.shape_cast %49 : vector<1x8x8xbf16> to vector<8x8xbf16>
    %cst_46 = arith.constant dense<0.000000e+00> : vector<8x288xf32>
    %51 = tpu.matmul %50, %48, %cst_46 {dimension_numbers = #tpu.dot_dimension_numbers<[1], [0], [0], [1], [0, 0, 1, 1], [], []>} : vector<8x8xbf16>, vector<8x288xbf16>, vector<8x288xf32> -> vector<8x288xf32>
    %52 = arith.addf %46, %51 : vector<8x288xf32>
    %c0_47 = arith.constant 0 : index
    %c0_48 = arith.constant 0 : index
    %53 = vector.load %arg3[%c0_47, %c0_48] : memref<8x1xf32, #tpu.memory_space<vmem>>, vector<8x1xf32>
    %54 = vector.broadcast %53 : vector<8x1xf32> to vector<8x288xf32>
    %55 = arith.addf %52, %54 : vector<8x288xf32>
    %cst_49 = arith.constant 0.000000e+00 : f32
    %56 = vector.broadcast %cst_49 : f32 to vector<8x288xf32>
    %57 = arith.maximumf %55, %56 : vector<8x288xf32>
    %c0_50 = arith.constant 0 : index
    %c0_51 = arith.constant 0 : index
    %c0_52 = arith.constant 0 : index
    %58 = vector.load %arg4[%c0_50, %c0_51, %c0_52] : memref<1x8x288xf32, #tpu.memory_space<vmem>>, vector<1x8x288xf32>
    %59 = vector.shape_cast %58 : vector<1x8x288xf32> to vector<8x288xf32>
    %60 = vector.shape_cast %57 : vector<8x288xf32> to vector<1x8x288xf32>
    tpu.vector_store %arg4[%c0_50, %c0_51, %c0_52], %60 {strides = array<i32>} : memref<1x8x288xf32, #tpu.memory_space<vmem>>, vector<1x8x288xf32>,
    return
  }
  func.func @transform_0(%arg0: i32) -> (i32, i32, i32) {
    %c0_i32 = arith.constant 0 : i32
    %c0_i32_0 = arith.constant 0 : i32
    %c0_i32_1 = arith.constant 0 : i32
    return %arg0, %c0_i32, %c0_i32_0 : i32, i32, i32
  }
  func.func @transform_1(%arg0: i32) -> (i32, i32, i32) {
    %c0_i32 = arith.constant 0 : i32
    %c0_i32_0 = arith.constant 0 : i32
    %c0_i32_1 = arith.constant 0 : i32
    %c0_i32_2 = arith.constant 0 : i32
    return %c0_i32, %c0_i32_0, %c0_i32_1 : i32, i32, i32
  }
  func.func @transform_2(%arg0: i32) -> (i32, i32) {
    %c0_i32 = arith.constant 0 : i32
    %c0_i32_0 = arith.constant 0 : i32
    %c0_i32_1 = arith.constant 0 : i32
    return %c0_i32, %c0_i32_0 : i32, i32
  }
  func.func @transform_3(%arg0: i32) -> (i32, i32, i32) {
    %c0_i32 = arith.constant 0 : i32
    %c0_i32_0 = arith.constant 0 : i32
    %c0_i32_1 = arith.constant 0 : i32
    return %arg0, %c0_i32, %c0_i32_0 : i32, i32, i32
  }
}

</mosaic_0001>

<bundles_post_ra>
// kernel: double_conv_forward.3
= control target key start
LH: loop header
LB: loop body
LE: loop exit
PB: predicated region body
PF: predicated region fallthrough
CT: control target
= control target key end

     0   :  { %s1385_s12 = smov 0   ;;  %s1520_s0 = inlined_call_operand.vmem [shape: bf16[2,8,342], index: 0, kind: input, shape index: {}]   ;;  %s1521_s1 = inlined_call_operand.vmem [shape: bf16[9,8,8], index: 1, kind: input, shape index: {}]   ;;  %s1522_s2 = inlined_call_operand.vmem [shape: f32[8,1], index: 2, kind: input, shape index: {}]   ;;  %s1523_s3 = inlined_call_operand.vmem [shape: f32[2,8,288], index: 3, kind: output, shape index: {}]  }
   0x1 LB: > { %s1202_s13 = sadd.s32 4294967295, %s1352_s12   ;;  %p1206_p0 = scmp.ge.s32.totalorder %s1352_s12, 1  ;;  %s1352_s12 = sphi %s1385_s12, %s13_s12  }
   0x2   : > { %p137_p1 = scmp.lt.s32.totalorder %s1352_s12, 3 }
   0x4   : > { %p138_p2 = pnand %p1206_p0, %p137_p1 }
   0x5   : > { %p161_p3 = scmp.lt.s32.totalorder (!%p138_p2), %s1202_s13, 1  ;;  %s1357_s18 = smov (!%p138_p2), 127  }
   0x6   : > { %141 = sbr.rel (%p138_p2) target bundleno = 408 (0x198), region = 32  ;;  %s1358_s19 = smov (!%p138_p2), 126  }
   0x7   : > { %s1359_s20 = smov (!%p138_p2), 110   ;;  %s1360_s21 = smov (!%p138_p2), 109  }
   0x8   : > { %s1361_s22 = smov (!%p138_p2), 108   ;;  %s1362_s23 = smov (!%p138_p2), 92  }
   0x9   : > { %s1363_s24 = smov (!%p138_p2), 91   ;;  %s1364_s25 = smov (!%p138_p2), 90  }
   0xb   : > { %v1354_v0 = vmov 0.0   ;;  %vm1355_vm0 = vmmov 0   ;;  %s1525_s13 = smov (!%p161_p3, %s1202_s13), 1  ;;  %v1356_v1 = vmov 0   ;;  %v1131_v6 = vld [vmem:[%s1522_s2] sm:$0xff]  ;;  %vm198_vm1 = vcmask 1043456  }
   0xc   : > { %1267 = vmatprep.subr.bf16.mxu1 %v1354_v0  ;;  %1269 = vmatprep.mubr.msk.bf16.mxu1 %vm1355_vm0, %v1354_v0  ;;  %s1321_s14 = smul.u32 12, %s1525_s13  ;;  %v1209_v10 = vld [vmem:[%s1521_s1 + $0x4] sm:$0xf]  ;;  %vm194_vm2 = vcmask 64512   ;;  %vm191_vm3 = vcmask 1039360   ;;  %vm390_vm4 = vcmask 1031168  }
   0xd   : > { %240 = vmatprep.mubr.bf16.mxu0 %v1356_v1  ;;  %1342 = vset.pattern.permute.xlu0 %v1356_v1  ;;  %v174_v20 = vld [vmem:[%s1521_s1] sm:$0xf]  ;;  %vm497_vm5 = vcmask 900096   ;;  %v1219_v29 = vld [vmem:[%s1521_s1 + $0x8] sm:$0xf]  ;;  %vm604_vm6 = vcmask 891904  }
   0xe   : > { %s165_s17 = scalar_lea.vmem %s1520_s0, %s1321_s14  ;;  %v1223_v37 = vld [vmem:[%s1521_s1 + $0xc] sm:$0xf]  ;;  %vm711_vm7 = vcmask 883712   ;;  %v1227_v45 = vld [vmem:[%s1521_s1 + $0x10] sm:$0xf]  ;;  %vm818_vm8 = vcmask 752640  }
   0xf   : > { %v1343_v2 = vld [vmem:[%s165_s17 + $0x8] ss:$0 sps:$4 sm:$0xff]   ;;  %v172_v3 = vld [vmem:[%s165_s17] sm:$0xff]  ;;  %v1231_v53 = vld [vmem:[%s1521_s1 + $0x14] sm:$0xf]  ;;  %vm925_vm9 = vcmask 744448  }
  0x10   : > { %v1210_v4 = vcombine.low %v172_v3, %v172_v3  ;;  %189 = vrot.lane.b32.xlu1 %v1343_v2, %s1357_s18  ;;  %v1211_v5 = vcombine.high %v172_v3, %v172_v3  ;;  %v299_v11 = vsel %vm198_vm1, %v1343_v2, 0  ;;  %v1235_v61 = vld [vmem:[%s1521_s1 + $0x18] sm:$0xf]  ;;  %vm1032_vm10 = vcmask 736256  }
  0x11   : > { %vm1145_vm11 = vcmask 261120  }
  0x12   : > { %185 = vrot.lane.b32.xlu0 %v1210_v4, %s1357_s18  ;;  %v293_v18 = vsel %vm198_vm1, %v1210_v4, 0 }
  0x14   : > { %384 = vrot.lane.b32.xlu1 %v1210_v4, %s1358_s19 }
  0x16   : > { %187 = vrot.lane.b32.xlu0 %v1211_v5, %s1357_s18 }
  0x18   : > { %388 = vrot.lane.b32.xlu1 %v1343_v2, %s1358_s19 }
  0x1a   : > { %386 = vrot.lane.b32.xlu0 %v1211_v5, %s1358_s19 }
  0x1c   : > { %493 = vrot.lane.b32.xlu1 %v1211_v5, %s1359_s20 }
  0x1e   : > { %491 = vrot.lane.b32.xlu0 %v1210_v4, %s1359_s20 }
  0x20   : > { %598 = vrot.lane.b32.xlu1 %v1210_v4, %s1360_s21 }
  0x22   : > { %495 = vrot.lane.b32.xlu0 %v1343_v2, %s1359_s20 }
  0x24   : > { %602 = vrot.lane.b32.xlu1 %v1343_v2, %s1360_s21 }
  0x26   : > { %600 = vrot.lane.b32.xlu0 %v1211_v5, %s1360_s21  ;;  %s1322_s21 = smul.u32 24, %s1525_s13 }
  0x28   : > { %707 = vrot.lane.b32.xlu1 %v1211_v5, %s1361_s22 }
  0x2a   : > { %705 = vrot.lane.b32.xlu0 %v1210_v4, %s1361_s22 }
  0x2c   : > { %812 = vrot.lane.b32.xlu1 %v1210_v4, %s1362_s23 }
  0x2e   : > { %709 = vrot.lane.b32.xlu0 %v1343_v2, %s1361_s22 }
  0x30   : > { %816 = vrot.lane.b32.xlu1 %v1343_v2, %s1362_s23 }
  0x32   : > { %814 = vrot.lane.b32.xlu0 %v1211_v5, %s1362_s23 }
  0x34   : > { %921 = vrot.lane.b32.xlu1 %v1211_v5, %s1363_s24 }
  0x36   : > { %919 = vrot.lane.b32.xlu0 %v1210_v4, %s1363_s24 }
  0x38   : > { %1026 = vrot.lane.b32.xlu1 %v1210_v4, %s1364_s25 }
  0x3a   : > { %923 = vrot.lane.b32.xlu0 %v1343_v2, %s1363_s24  ;;  %s170_s24 = scalar_lea.vmem %s1523_s3, %s1322_s21 }
  0x3c   : > { %1030 = vrot.lane.b32.xlu1 %v1343_v2, %s1364_s25 }
  0x3e   : > { %1028 = vrot.lane.b32.xlu0 %v1211_v5, %s1364_s25 }
  0x42   : > { %1134 = vperm.xlu0 %1342, %v1131_v6   ;;  %v1239_v6 = vld [vmem:[%s1521_s1 + $0x1c] sm:$0xf] }
  0x82   : > { %v190_v7 = vpop.permute.xlu1 %189 }
  0x83   : > { %v206_v9 = vsel %vm198_vm1, %v190_v7, 0 }
  0x84   : > { %v186_v8 = vpop.permute.xlu0 %185  ;;  %1268 = vmatpush3.bf16.msra.mxu1 %v206_v9 }
  0x85   : > { %1273 = vmatprep.subr.bf16.mxu1 %v1354_v0 }
  0x86   : > { %v385_v12 = vpop.permute.xlu1 %384 }
  0x87   : > { %1270 = vmatmul.mubr.msk.bf16.vlgmr.msra.gmra.mxu1 %vm194_vm2, %v1209_v10 }
  0x88   : > { %v188_v13 = vpop.permute.xlu0 %187  ;;  %1274 = vmatpush3.bf16.msra.mxu1 %v299_v11  ;;  %1275 = vmatprep.mubr.msk.bf16.mxu1 %vm1355_vm0, %v1354_v0  ;;  %v1243_v11 = vld [vmem:[%s1521_s1 + $0x20] sm:$0xf] }
  0x89   : > { %v193_v14 = vsel %vm191_vm3, %v188_v13, %v190_v7  ;;  %v192_v15 = vsel %vm191_vm3, %v186_v8, %v188_v13  ;;  %1279 = vmatprep.subr.bf16.mxu1 %v1354_v0 }
  0x8a   : > { %1213 = vmatprep.subr.msk.bf16.mxu0 %vm198_vm1, %v193_v14  ;;  %v200_v16 = vsel %vm198_vm1, %v192_v15, 0  ;;  %v389_v17 = vpop.permute.xlu1 %388 }
  0x8b   : > { %223 = vmatpush1.bf16.msra.mxu0 %v200_v16  ;;  %v403_v22 = vsel %vm198_vm1, %v389_v17, 0 }
  0x8c   : > { %1216 = vmatprep.subr.msk.bf16.mxu0 %vm198_vm1, %v1211_v5  ;;  %v387_v19 = vpop.permute.xlu0 %386 }
  0x8d   : > { %v392_v21 = vsel %vm390_vm4, %v387_v19, %v389_v17  ;;  %v391_v25 = vsel %vm390_vm4, %v385_v12, %v387_v19 }
  0x8e   : > { %1214 = vmatmul.mubr.msk.bf16.vlgmr.msra.gmra.mxu0 %vm194_vm2, %v1209_v10  ;;  %v494_v23 = vpop.permute.xlu1 %493  ;;  %v397_v26 = vsel %vm198_vm1, %v391_v25, 0 }
  0x8f   : > { %316 = vmatpush1.bf16.msra.mxu0 %v293_v18  ;;  %333 = vmatprep.mubr.bf16.mxu0 %v1356_v1 }
  0x90   : > { %1276 = vmatmul.mubr.msk.bf16.vlgmr.msra.gmra.mxu1 %vm194_vm2, %v174_v20  ;;  %1220 = vmatprep.subr.msk.bf16.mxu0 %vm198_vm1, %v392_v21  ;;  %v492_v24 = vpop.permute.xlu0 %491 }
  0x91   : > { %1280 = vmatpush3.bf16.msra.mxu1 %v403_v22  ;;  %1281 = vmatprep.mubr.msk.bf16.mxu1 %vm1355_vm0, %v1354_v0  ;;  %v498_v33 = vsel %vm497_vm5, %v492_v24, %v494_v23 }
  0x92   : > { %1285 = vmatprep.subr.bf16.mxu1 %v1354_v0  ;;  %v599_v28 = vpop.permute.xlu1 %598  ;;  %v504_v35 = vsel %vm198_vm1, %v498_v33, 0 }
  0x94   : > { %v496_v27 = vpop.permute.xlu0 %495 }
  0x95   : > { %v499_v30 = vsel %vm497_vm5, %v494_v23, %v496_v27  ;;  %v510_v31 = vsel %vm198_vm1, %v496_v27, 0 }
  0x96   : > { %1217 = vmatmul.mubr.msk.bf16.vlgmr.msra.gmra.mxu0 %vm194_vm2, %v174_v20  ;;  %v603_v34 = vpop.permute.xlu1 %602 }
  0x97   : > { %420 = vmatpush1.bf16.msra.mxu0 %v397_v26  ;;  %437 = vmatprep.mubr.bf16.mxu0 %v1356_v1  ;;  %v617_v39 = vsel %vm198_vm1, %v603_v34, 0 }
  0x98   : > { %1282 = vmatmul.mubr.msk.bf16.vlgmr.msra.gmra.mxu1 %vm194_vm2, %v1219_v29  ;;  %1224 = vmatprep.subr.msk.bf16.mxu0 %vm198_vm1, %v499_v30  ;;  %v601_v32 = vpop.permute.xlu0 %600 }
  0x99   : > { %1286 = vmatpush3.bf16.msra.mxu1 %v510_v31  ;;  %1287 = vmatprep.mubr.msk.bf16.mxu1 %vm1355_vm0, %v1354_v0  ;;  %v606_v38 = vsel %vm604_vm6, %v601_v32, %v603_v34  ;;  %v605_v41 = vsel %vm604_vm6, %v599_v28, %v601_v32 }
  0x9a   : > { %1291 = vmatprep.subr.bf16.mxu1 %v1354_v0  ;;  %v708_v40 = vpop.permute.xlu1 %707  ;;  %v611_v43 = vsel %vm198_vm1, %v605_v41, 0 }
  0x9c   : > { %v706_v36 = vpop.permute.xlu0 %705 }
  0x9d   : > { %v712_v49 = vsel %vm711_vm7, %v706_v36, %v708_v40 }
  0x9e   : > { %1221 = vmatmul.mubr.msk.bf16.vlgmr.msra.gmra.mxu0 %vm194_vm2, %v1219_v29  ;;  %v813_v44 = vpop.permute.xlu1 %812  ;;  %v718_v51 = vsel %vm198_vm1, %v712_v49, 0 }
  0x9f   : > { %527 = vmatpush1.bf16.msra.mxu0 %v504_v35  ;;  %544 = vmatprep.mubr.bf16.mxu0 %v1356_v1 }
  0xa0   : > { %1288 = vmatmul.mubr.msk.bf16.vlgmr.msra.gmra.mxu1 %vm194_vm2, %v1223_v37  ;;  %1228 = vmatprep.subr.msk.bf16.mxu0 %vm198_vm1, %v606_v38  ;;  %v710_v42 = vpop.permute.xlu0 %709 }
  0xa1   : > { %1292 = vmatpush3.bf16.msra.mxu1 %v617_v39  ;;  %1293 = vmatprep.mubr.msk.bf16.mxu1 %vm1355_vm0, %v1354_v0  ;;  %v713_v46 = vsel %vm711_vm7, %v708_v40, %v710_v42  ;;  %v724_v47 = vsel %vm198_vm1, %v710_v42, 0 }
  0xa2   : > { %1297 = vmatprep.subr.bf16.mxu1 %v1354_v0  ;;  %v817_v50 = vpop.permute.xlu1 %816 }
  0xa3   : > { %v831_v55 = vsel %vm198_vm1, %v817_v50, 0 }
  0xa4   : > { %v815_v48 = vpop.permute.xlu0 %814 }
  0xa5   : > { %v820_v54 = vsel %vm818_vm8, %v815_v48, %v817_v50  ;;  %v819_v57 = vsel %vm818_vm8, %v813_v44, %v815_v48 }
  0xa6   : > { %1225 = vmatmul.mubr.msk.bf16.vlgmr.msra.gmra.mxu0 %vm194_vm2, %v1223_v37  ;;  %v922_v56 = vpop.permute.xlu1 %921  ;;  %v825_v59 = vsel %vm198_vm1, %v819_v57, 0 }
  0xa7   : > { %634 = vmatpush1.bf16.msra.mxu0 %v611_v43  ;;  %651 = vmatprep.mubr.bf16.mxu0 %v1356_v1 }
  0xa8   : > { %1294 = vmatmul.mubr.msk.bf16.vlgmr.msra.gmra.mxu1 %vm194_vm2, %v1227_v45  ;;  %1232 = vmatprep.subr.msk.bf16.mxu0 %vm198_vm1, %v713_v46  ;;  %v920_v52 = vpop.permute.xlu0 %919 }
  0xa9   : > { %1298 = vmatpush3.bf16.msra.mxu1 %v724_v47  ;;  %1299 = vmatprep.mubr.msk.bf16.mxu1 %vm1355_vm0, %v1354_v0  ;;  %v926_v2 = vsel %vm925_vm9, %v920_v52, %v922_v56 }
  0xaa   : > { %1303 = vmatprep.subr.bf16.mxu1 %v1354_v0  ;;  %v1027_v60 = vpop.permute.xlu1 %1026  ;;  %v932_v5 = vsel %vm198_vm1, %v926_v2, 0 }
  0xac   : > { %v924_v58 = vpop.permute.xlu0 %923 }
  0xad   : > { %v927_v62 = vsel %vm925_vm9, %v922_v56, %v924_v58  ;;  %v938_v63 = vsel %vm198_vm1, %v924_v58, 0 }
  0xae   : > { %1229 = vmatmul.mubr.msk.bf16.vlgmr.msra.gmra.mxu0 %vm194_vm2, %v1227_v45  ;;  %v1031_v4 = vpop.permute.xlu1 %1030 }
  0xaf   : > { %741 = vmatpush1.bf16.msra.mxu0 %v718_v51  ;;  %758 = vmatprep.mubr.bf16.mxu0 %v1356_v1  ;;  %v1045_v8 = vsel %vm198_vm1, %v1031_v4, 0 }
  0xb0   : > { %1300 = vmatmul.mubr.msk.bf16.vlgmr.msra.gmra.mxu1 %vm194_vm2, %v1231_v53  ;;  %1236 = vmatprep.subr.msk.bf16.mxu0 %vm198_vm1, %v820_v54  ;;  %v1029_v3 = vpop.permute.xlu0 %1028 }
  0xb1   : > { %1304 = vmatpush3.bf16.msra.mxu1 %v831_v55  ;;  %1305 = vmatprep.mubr.msk.bf16.mxu1 %vm1355_vm0, %v1354_v0  ;;  %v1034_v7 = vsel %vm1032_vm10, %v1029_v3, %v1031_v4  ;;  %v1033_v9 = vsel %vm1032_vm10, %v1027_v60, %v1029_v3 }
  0xb2   : > { %1309 = vmatprep.subr.bf16.mxu1 %v1354_v0  ;;  %v1039_v10 = vsel %vm198_vm1, %v1033_v9, 0 }
  0xb6   : > { %1233 = vmatmul.mubr.msk.bf16.vlgmr.msra.gmra.mxu0 %vm194_vm2, %v1231_v53 }
  0xb7   : > { %848 = vmatpush1.bf16.msra.mxu0 %v825_v59  ;;  %865 = vmatprep.mubr.bf16.mxu0 %v1356_v1 }
  0xb8   : > { %1306 = vmatmul.mubr.msk.bf16.vlgmr.msra.gmra.mxu1 %vm194_vm2, %v1235_v61  ;;  %1240 = vmatprep.subr.msk.bf16.mxu0 %vm198_vm1, %v927_v62 }
  0xb9   : > { %1310 = vmatpush3.bf16.msra.mxu1 %v938_v63  ;;  %1311 = vmatprep.mubr.msk.bf16.mxu1 %vm1355_vm0, %v1354_v0 }
  0xba   : > { %1315 = vmatprep.subr.bf16.mxu1 %v1354_v0 }
  0xbe   : > { %1237 = vmatmul.mubr.msk.bf16.vlgmr.msra.gmra.mxu0 %vm194_vm2, %v1235_v61 }
  0xbf   : > { %955 = vmatpush1.bf16.msra.mxu0 %v932_v5  ;;  %972 = vmatprep.mubr.bf16.mxu0 %v1356_v1 }
  0xc0   : > { %1312 = vmatmul.mubr.msk.bf16.vlgmr.msra.gmra.mxu1 %vm194_vm2, %v1239_v6  ;;  %1244 = vmatprep.subr.msk.bf16.mxu0 %vm198_vm1, %v1034_v7 }
  0xc1   : > { %1316 = vmatpush3.bf16.msra.mxu1 %v1045_v8  ;;  %1317 = vmatprep.mubr.msk.bf16.mxu1 %vm1355_vm0, %v1354_v0 }
  0xc6   : > { %1241 = vmatmul.mubr.msk.bf16.vlgmr.msra.gmra.mxu0 %vm194_vm2, %v1239_v6 }
  0xc7   : > { %1062 = vmatpush1.bf16.msra.mxu0 %v1039_v10  ;;  %1079 = vmatprep.mubr.bf16.mxu0 %v1356_v1 }
  0xc8   : > { %1318 = vmatmul.mubr.msk.bf16.vlgmr.msra.gmra.mxu1 %vm194_vm2, %v1243_v11 }
  0xce   : > { %1245 = vmatmul.mubr.msk.bf16.vlgmr.msra.gmra.mxu0 %vm194_vm2, %v1243_v11 }
 0x147   : > { %v283_v12 = vpop.f32.mrf.mxu1 }
 0x149   : > { %v1271_v13 = vpop.f32.mrf.mxu1 }
 0x14b   : > { %v286_v14 = vpop.f32.mrf.mxu1 }
 0x14d   : > { %v1272_v0 = vpop.f32.mrf.mxu1 }
 0x14e   : > { %v242_v15 = vpop.f32.mrf.mxu0 }
 0x150   : > { %v244_v16 = vpop.f32.mrf.mxu0  ;;  %v376_v17 = vpop.f32.mrf.mxu1 }
 0x151   : > { %v377_v59 = vadd.f32 %v376_v17, %v283_v12 }
 0x152   : > { %v246_v18 = vpop.f32.mrf.mxu0  ;;  %v1277_v19 = vpop.f32.mrf.mxu1 }
 0x154   : > { %v247_v20 = vpop.f32.mrf.mxu0  ;;  %v379_v21 = vpop.f32.mrf.mxu1 }
 0x156   : > { %v335_v22 = vpop.f32.mrf.mxu0  ;;  %v1278_v23 = vpop.f32.mrf.mxu1 }
 0x157   : > { %v336_v6 = vadd.f32 %v335_v22, %v242_v15 }
 0x158   : > { %v337_v24 = vpop.f32.mrf.mxu0  ;;  %v480_v25 = vpop.f32.mrf.mxu1 }
 0x159   : > { %v488_v62 = vadd.f32 %v480_v25, %v377_v59  ;;  %v338_v10 = vadd.f32 %v337_v24, %v244_v16 }
 0x15a   : > { %v339_v1 = vpop.f32.mrf.mxu0  ;;  %v1283_v26 = vpop.f32.mrf.mxu1 }
 0x15b   : > { %v1135_v1 = vpop.permute.xlu0 %1134 }
 0x15c   : > { %v340_v27 = vpop.f32.mrf.mxu0  ;;  %v483_v28 = vpop.f32.mrf.mxu1 }
 0x15e   : > { %v439_v29 = vpop.f32.mrf.mxu0  ;;  %v1284_v30 = vpop.f32.mrf.mxu1 }
 0x15f   : > { %v486_v11 = vadd.f32 %v439_v29, %v336_v6 }
 0x160   : > { %v441_v31 = vpop.f32.mrf.mxu0  ;;  %v587_v32 = vpop.f32.mrf.mxu1 }
 0x161   : > { %v595_v3 = vadd.f32 %v587_v32, %v488_v62  ;;  %v487_v18 = vadd.f32 %v441_v31, %v338_v10 }
 0x162   : > { %v443_v33 = vpop.f32.mrf.mxu0  ;;  %v1289_v34 = vpop.f32.mrf.mxu1 }
 0x164   : > { %v444_v35 = vpop.f32.mrf.mxu0  ;;  %v590_v36 = vpop.f32.mrf.mxu1 }
 0x166   : > { %v546_v37 = vpop.f32.mrf.mxu0  ;;  %v1290_v38 = vpop.f32.mrf.mxu1 }
 0x167   : > { %v593_v12 = vadd.f32 %v546_v37, %v486_v11 }
 0x168   : > { %v548_v39 = vpop.f32.mrf.mxu0  ;;  %v694_v40 = vpop.f32.mrf.mxu1 }
 0x169   : > { %v702_v7 = vadd.f32 %v694_v40, %v595_v3  ;;  %v594_v21 = vadd.f32 %v548_v39, %v487_v18 }
 0x16a   : > { %v550_v41 = vpop.f32.mrf.mxu0  ;;  %v1295_v42 = vpop.f32.mrf.mxu1 }
 0x16c   : > { %v551_v43 = vpop.f32.mrf.mxu0  ;;  %v697_v44 = vpop.f32.mrf.mxu1 }
 0x16e   : > { %v653_v45 = vpop.f32.mrf.mxu0  ;;  %v1296_v46 = vpop.f32.mrf.mxu1 }
 0x16f   : > { %v700_v23 = vadd.f32 %v653_v45, %v593_v12 }
 0x170   : > { %v655_v47 = vpop.f32.mrf.mxu0  ;;  %v801_v48 = vpop.f32.mrf.mxu1 }
 0x171   : > { %v809_v13 = vadd.f32 %v801_v48, %v702_v7  ;;  %v701_v22 = vadd.f32 %v655_v47, %v594_v21 }
 0x172   : > { %v657_v49 = vpop.f32.mrf.mxu0  ;;  %v1301_v50 = vpop.f32.mrf.mxu1 }
 0x174   : > { %v658_v51 = vpop.f32.mrf.mxu0  ;;  %v804_v52 = vpop.f32.mrf.mxu1 }
 0x176   : > { %v760_v53 = vpop.f32.mrf.mxu0  ;;  %v1302_v54 = vpop.f32.mrf.mxu1 }
 0x177   : > { %v807_v27 = vadd.f32 %v760_v53, %v700_v23 }
 0x178   : > { %v762_v55 = vpop.f32.mrf.mxu0  ;;  %v908_v56 = vpop.f32.mrf.mxu1 }
 0x179   : > { %v916_v17 = vadd.f32 %v908_v56, %v809_v13  ;;  %v808_v29 = vadd.f32 %v762_v55, %v701_v22 }
 0x17a   : > { %v764_v57 = vpop.f32.mrf.mxu0  ;;  %v1307_v58 = vpop.f32.mrf.mxu1 }
 0x17c   : > { %v765_v60 = vpop.f32.mrf.mxu0  ;;  %v911_v61 = vpop.f32.mrf.mxu1 }
 0x17e   : > { %v867_v63 = vpop.f32.mrf.mxu0  ;;  %v1308_v2 = vpop.f32.mrf.mxu1 }
 0x17f   : > { %v914_v30 = vadd.f32 %v867_v63, %v807_v27 }
 0x180   : > { %v869_v4 = vpop.f32.mrf.mxu0  ;;  %v1015_v5 = vpop.f32.mrf.mxu1 }
 0x181   : > { %v1023_v25 = vadd.f32 %v1015_v5, %v916_v17  ;;  %v915_v34 = vadd.f32 %v869_v4, %v808_v29 }
 0x182   : > { %v871_v8 = vpop.f32.mrf.mxu0  ;;  %v1313_v9 = vpop.f32.mrf.mxu1 }
 0x184   : > { %v872_v14 = vpop.f32.mrf.mxu0  ;;  %v1018_v0 = vpop.f32.mrf.mxu1 }
 0x186   : > { %v974_v19 = vpop.f32.mrf.mxu0  ;;  %v1314_v20 = vpop.f32.mrf.mxu1 }
 0x187   : > { %v1021_v35 = vadd.f32 %v974_v19, %v914_v30 }
 0x188   : > { %v976_v26 = vpop.f32.mrf.mxu0  ;;  %v1122_v15 = vpop.f32.mrf.mxu1 }
 0x189   : > { %v1130_v16 = vadd.f32 %v1122_v15, %v1023_v25  ;;  %v1022_v39 = vadd.f32 %v976_v26, %v915_v34 }
 0x18a   : > { %v978_v24 = vpop.f32.mrf.mxu0  ;;  %v1319_v28 = vpop.f32.mrf.mxu1 }
 0x18b   : > { %v1139_v32 = vadd.f32 %v1135_v1, %v1130_v16 }
 0x18c   : > { %v979_v31 = vpop.f32.mrf.mxu0  ;;  %v1125_v33 = vpop.f32.mrf.mxu1 }
 0x18d   : > { %v1142_v36 = vmax.f32 %v1139_v32, 0.0 }
 0x18e   : > { %v1081_v37 = vpop.f32.mrf.mxu0  ;;  %v1320_v38 = vpop.f32.mrf.mxu1 }
 0x18f   : > { %1146 = vst.msk [vmem:[%s170_s24 + $0x10] sm:$0xff] %vm1145_vm11, %v1142_v36  ;;  %v1128_v40 = vadd.f32 %v1081_v37, %v1021_v35 }
 0x190   : > { %v1083_v41 = vpop.f32.mrf.mxu0 }
 0x191   : > { %v1137_v42 = vadd.f32 %v1135_v1, %v1128_v40  ;;  %v1129_v43 = vadd.f32 %v1083_v41, %v1022_v39 }
 0x192   : > { %v1085_v44 = vpop.f32.mrf.mxu0 }
 0x193   : > { %v1140_v45 = vmax.f32 %v1137_v42, 0.0  ;;  %v1138_v46 = vadd.f32 %v1135_v1, %v1129_v43 }
 0x194   : > { %v1086_v47 = vpop.f32.mrf.mxu0 }
 0x195   : > { %1143 = vst [vmem:[%s170_s24] sm:$0xff] %v1140_v45  ;;  %v1141_v48 = vmax.f32 %v1138_v46, 0.0 }
 0x197   : > { %1144 = vst [vmem:[%s170_s24 + $0x8] sm:$0xff] %v1141_v48 }
 0x198 PF: > { %s13_s12 = sadd.s32 1, %s1352_s12  }
 0x199   : > { %p10_p4 = scmp.ge.s32.totalorder %s13_s12, 4  }
 0x19b   :  { %12 = sbr.rel (!%p10_p4) target bundleno = 1 (0x1), region = 70 }

// kernel: double_conv_forward.2
= control target key start
LH: loop header
LB: loop body
LE: loop exit
PB: predicated region body
PF: predicated region fallthrough
CT: control target
= control target key end

     0   :  { %s1539_s12 = smov 0   ;;  %s1716_s0 = inlined_call_operand.vmem [shape: bf16[2,4,342], index: 0, kind: input, shape index: {}]   ;;  %s1717_s1 = inlined_call_operand.vmem [shape: bf16[9,8,4], index: 1, kind: input, shape index: {}]   ;;  %s1718_s2 = inlined_call_operand.vmem [shape: f32[8,1], index: 2, kind: input, shape index: {}]   ;;  %s1719_s3 = inlined_call_operand.vmem [shape: bf16[2,8,288], index: 3, kind: output, shape index: {}]  }
   0x1 LB: > { %s1348_s13 = sadd.s32 4294967295, %s1505_s12   ;;  %p1352_p0 = scmp.ge.s32.totalorder %s1505_s12, 1  ;;  %s1505_s12 = sphi %s1539_s12, %s13_s12  }
   0x2   : > { %p137_p1 = scmp.lt.s32.totalorder %s1505_s12, 3 }
   0x4   : > { %p138_p2 = pnand %p1352_p0, %p137_p1 }
   0x5   : > { %p161_p3 = scmp.lt.s32.totalorder (!%p138_p2), %s1348_s13, 1  ;;  %s1511_s18 = smov (!%p138_p2), 127  }
   0x6   : > { %141 = sbr.rel (%p138_p2) target bundleno = 412 (0x19c), region = 32  ;;  %s1512_s19 = smov (!%p138_p2), 126  }
   0x7   : > { %s1513_s20 = smov (!%p138_p2), 110   ;;  %s1514_s21 = smov (!%p138_p2), 109  }
   0x8   : > { %s1515_s22 = smov (!%p138_p2), 108   ;;  %s1516_s23 = smov (!%p138_p2), 92  }
   0x9   : > { %s1517_s24 = smov (!%p138_p2), 91   ;;  %s1518_s25 = smov (!%p138_p2), 90  }
   0xb   : > { %v181_v0 = vlaneseq  ;;  %v1507_v1 = vmov 1983009808   ;;  %v1508_v3 = vmov 0.0   ;;  %s1721_s13 = smov (!%p161_p3, %s1348_s13), 1  ;;  %vm1509_vm0 = vmmov 0   ;;  %v1265_v48 = vld [vmem:[%s1718_s2] sm:$0xff] }
   0xc   : > { %v179_v2 = vunpack.c.l.s4 %v1507_v1  ;;  %1414 = vmatprep.subr.bf16.mxu1 %v1508_v3  ;;  %1416 = vmatprep.mubr.msk.bf16.mxu1 %vm1509_vm0, %v1508_v3  ;;  %s1468_s14 = smul.u32 6, %s1721_s13  ;;  %v1510_v6 = vmov 0   ;;  %vm206_vm1 = vcmask 1041408   ;;  %vm199_vm2 = vcmask 1039360   ;;  %v1355_v53 = vld [vmem:[%s1717_s1 + $0x4] sm:$0xf] }
   0xd   : > { %v182_v4 = vshrl.u32 %v181_v0, 7  ;;  %248 = vmatprep.mubr.bf16.mxu0 %v1510_v6  ;;  %1490 = vset.pattern.permute.xlu0 %v1510_v6  ;;  %vm202_vm3 = vcmask 31744   ;;  %vm416_vm4 = vcmask 1031168   ;;  %v173_v63 = vld [vmem:[%s1717_s1] sm:$0xf]  ;;  %vm541_vm5 = vcmask 900096  }
   0xe   : > { %v180_v5 = vunpack.c.0.s8 %v179_v2  ;;  %s1560_s17 = scalar_lea.vmem %s1716_s0, %s1468_s14  ;;  %vm666_vm6 = vcmask 891904   ;;  %vm791_vm7 = vcmask 883712   ;;  %vm916_vm8 = vcmask 752640  }
   0xf   : > { %v172_v8 = vld [vmem:[%s1560_s17] sm:$0x3f]  ;;  %vm1041_vm9 = vcmask 744448   ;;  %vm1166_vm10 = vcmask 736256   ;;  %vm1291_vm11 = vcmask 257024  }
  0x10   : > { %v1555_v7 = vsub.s32 %v180_v5, %v182_v4  ;;  %v177_v10 = vcombine.high %v172_v8, %v172_v8  ;;  %v390_v11 = vld [vmem:[%s1560_s17] sm:$0x3f] }
  0x11   : > { %v394_v15 = vcombine.high %v390_v11, %v390_v11  ;;  %v515_v17 = vld [vmem:[%s1560_s17] sm:$0x3f] }
  0x12   : > { %v1564_v9 = vrot.slane %v172_v8, %v1555_v7  ;;  %v1569_v12 = vrot.slane %v177_v10, %v1555_v7  ;;  %v401_v14 = vrot.slane %v390_v11, %v1555_v7  ;;  %v526_v19 = vrot.slane %v515_v17, %v1555_v7  ;;  %v640_v22 = vld [vmem:[%s1560_s17] sm:$0x3f]  ;;  %v1362_v10 = vld [vmem:[%s1717_s1 + $0x8] sm:$0xf] }
  0x13   : > { %v408_v18 = vrot.slane %v394_v15, %v1555_v7  ;;  %v519_v20 = vcombine.high %v515_v17, %v515_v17  ;;  %v651_v24 = vrot.slane %v640_v22, %v1555_v7  ;;  %v644_v25 = vcombine.high %v640_v22, %v640_v22  ;;  %v765_v27 = vld [vmem:[%s1560_s17] sm:$0x3f] }
  0x14   : > { %193 = vrot.lane.b32.xlu0 %v1564_v9, %s1511_s18  ;;  %v1573_v13 = vcombine.high %v1564_v9, %v1564_v9  ;;  %197 = vrot.lane.b32.xlu1 %v1569_v12, %s1511_s18  ;;  %v409_v16 = vcombine.high %v401_v14, %v401_v14  ;;  %v534_v21 = vcombine.high %v526_v19, %v526_v19  ;;  %v890_v32 = vld [vmem:[%s1560_s17] sm:$0x3f]  ;;  %v307_v56 = vsel %vm206_vm1, %v1569_v12, 0 }
  0x15   : > { %v533_v23 = vrot.slane %v519_v20, %v1555_v7  ;;  %v659_v26 = vcombine.high %v651_v24, %v651_v24  ;;  %v658_v28 = vrot.slane %v644_v25, %v1555_v7  ;;  %v776_v29 = vrot.slane %v765_v27, %v1555_v7  ;;  %v1015_v37 = vld [vmem:[%s1560_s17] sm:$0x3f] }
  0x16   : > { %v769_v30 = vcombine.high %v765_v27, %v765_v27  ;;  %v901_v34 = vrot.slane %v890_v32, %v1555_v7  ;;  %v894_v35 = vcombine.high %v890_v32, %v890_v32  ;;  %v1026_v39 = vrot.slane %v1015_v37, %v1555_v7  ;;  %v1140_v42 = vld [vmem:[%s1560_s17] sm:$0x3f]  ;;  %v1370_v27 = vld [vmem:[%s1717_s1 + $0x10] sm:$0xf] }
  0x17   : > { %v784_v31 = vcombine.high %v776_v29, %v776_v29  ;;  %v1019_v40 = vcombine.high %v1015_v37, %v1015_v37  ;;  %v1151_v44 = vrot.slane %v1140_v42, %v1555_v7  ;;  %v1144_v45 = vcombine.high %v1140_v42, %v1140_v42  ;;  %v1378_v42 = vld [vmem:[%s1717_s1 + $0x18] sm:$0xf] }
  0x18   : > { %195 = vrot.lane.b32.xlu0 %v1573_v13, %s1511_s18  ;;  %410 = vrot.lane.b32.xlu1 %v401_v14, %s1512_s19  ;;  %v783_v33 = vrot.slane %v769_v30, %v1555_v7  ;;  %v909_v36 = vcombine.high %v901_v34, %v901_v34  ;;  %v908_v38 = vrot.slane %v894_v35, %v1555_v7  ;;  %v301_v59 = vsel %vm206_vm1, %v1564_v9, 0  ;;  %v1374_v35 = vld [vmem:[%s1717_s1 + $0x14] sm:$0xf] }
  0x19   : > { %v1034_v41 = vcombine.high %v1026_v39, %v1026_v39  ;;  %v1033_v43 = vrot.slane %v1019_v40, %v1555_v7  ;;  %v1159_v46 = vcombine.high %v1151_v44, %v1151_v44  ;;  %v1158_v47 = vrot.slane %v1144_v45, %v1555_v7 }
  0x1c   : > { %412 = vrot.lane.b32.xlu0 %v409_v16, %s1512_s19  ;;  %414 = vrot.lane.b32.xlu1 %v408_v18, %s1512_s19 }
  0x20   : > { %535 = vrot.lane.b32.xlu0 %v526_v19, %s1513_s20  ;;  %537 = vrot.lane.b32.xlu1 %v534_v21, %s1513_s20  ;;  %v1366_v19 = vld [vmem:[%s1717_s1 + $0xc] sm:$0xf] }
  0x24   : > { %539 = vrot.lane.b32.xlu0 %v533_v23, %s1513_s20  ;;  %660 = vrot.lane.b32.xlu1 %v651_v24, %s1514_s21 }
  0x28   : > { %662 = vrot.lane.b32.xlu0 %v659_v26, %s1514_s21  ;;  %664 = vrot.lane.b32.xlu1 %v658_v28, %s1514_s21  ;;  %s1469_s21 = smul.u32 12, %s1721_s13 }
  0x2c   : > { %785 = vrot.lane.b32.xlu0 %v776_v29, %s1515_s22  ;;  %787 = vrot.lane.b32.xlu1 %v784_v31, %s1515_s22 }
  0x30   : > { %789 = vrot.lane.b32.xlu0 %v783_v33, %s1515_s22  ;;  %910 = vrot.lane.b32.xlu1 %v901_v34, %s1516_s23 }
  0x34   : > { %912 = vrot.lane.b32.xlu0 %v909_v36, %s1516_s23  ;;  %914 = vrot.lane.b32.xlu1 %v908_v38, %s1516_s23 }
  0x38   : > { %1035 = vrot.lane.b32.xlu0 %v1026_v39, %s1517_s24  ;;  %1037 = vrot.lane.b32.xlu1 %v1034_v41, %s1517_s24 }
  0x3c   : > { %1039 = vrot.lane.b32.xlu0 %v1033_v43, %s1517_s24  ;;  %1160 = vrot.lane.b32.xlu1 %v1151_v44, %s1518_s25  ;;  %s170_s24 = scalar_lea.vmem %s1719_s3, %s1469_s21 }
  0x40   : > { %1162 = vrot.lane.b32.xlu0 %v1159_v46, %s1518_s25  ;;  %1164 = vrot.lane.b32.xlu1 %v1158_v47, %s1518_s25 }
  0x44   : > { %1268 = vperm.xlu0 %1490, %v1265_v48  }
  0x86   : > { %v194_v49 = vpop.permute.xlu0 %193  ;;  %v198_v50 = vpop.permute.xlu1 %197 }
  0x87   : > { %v214_v51 = vsel %vm206_vm1, %v198_v50, 0 }
  0x88   : > { %1415 = vmatpush3.bf16.msra.mxu1 %v214_v51 }
  0x89   : > { %1420 = vmatprep.subr.bf16.mxu1 %v1508_v3 }
  0x8a   : > { %v196_v52 = vpop.permute.xlu0 %195  ;;  %v411_v58 = vpop.permute.xlu1 %410 }
  0x8b   : > { %v201_v54 = vsel %vm199_vm2, %v196_v52, %v198_v50  ;;  %v200_v55 = vsel %vm199_vm2, %v194_v49, %v196_v52  ;;  %1417 = vmatmul.mubr.msk.bf16.vlgmr.msra.gmra.mxu1 %vm202_vm3, %v1355_v53  ;;  %v1382_v49 = vld [vmem:[%s1717_s1 + $0x1c] sm:$0xf] }
  0x8c   : > { %1356 = vmatprep.subr.msk.bf16.mxu0 %vm206_vm1, %v201_v54  ;;  %v208_v57 = vsel %vm206_vm1, %v200_v55, 0  ;;  %1421 = vmatpush3.bf16.msra.mxu1 %v307_v56 }
  0x8d   : > { %231 = vmatpush1.bf16.msra.mxu0 %v208_v57  ;;  %1422 = vmatprep.mubr.msk.bf16.mxu1 %vm1509_vm0, %v1508_v3 }
  0x8e   : > { %1359 = vmatprep.subr.msk.bf16.mxu0 %vm206_vm1, %v1573_v13  ;;  %v413_v60 = vpop.permute.xlu0 %412  ;;  %1426 = vmatprep.subr.bf16.mxu1 %v1508_v3  ;;  %v415_v61 = vpop.permute.xlu1 %414 }
  0x8f   : > { %v418_v62 = vsel %vm416_vm4, %v413_v60, %v415_v61  ;;  %v417_v1 = vsel %vm416_vm4, %v411_v58, %v413_v60  ;;  %v429_v2 = vsel %vm206_vm1, %v415_v61, 0 }
  0x90   : > { %1357 = vmatmul.mubr.msk.bf16.vlgmr.msra.gmra.mxu0 %vm202_vm3, %v1355_v53  ;;  %v423_v5 = vsel %vm206_vm1, %v417_v1, 0  ;;  %v1386_v53 = vld [vmem:[%s1717_s1 + $0x20] sm:$0xf] }
  0x91   : > { %324 = vmatpush1.bf16.msra.mxu0 %v301_v59  ;;  %341 = vmatprep.mubr.bf16.mxu0 %v1510_v6 }
  0x92   : > { %1363 = vmatprep.subr.msk.bf16.mxu0 %vm206_vm1, %v418_v62  ;;  %v536_v0 = vpop.permute.xlu0 %535  ;;  %v538_v4 = vpop.permute.xlu1 %537 }
  0x93   : > { %1423 = vmatmul.mubr.msk.bf16.vlgmr.msra.gmra.mxu1 %vm202_vm3, %v173_v63  ;;  %v542_v12 = vsel %vm541_vm5, %v536_v0, %v538_v4 }
  0x94   : > { %1427 = vmatpush3.bf16.msra.mxu1 %v429_v2  ;;  %1428 = vmatprep.mubr.msk.bf16.mxu1 %vm1509_vm0, %v1508_v3  ;;  %v548_v15 = vsel %vm206_vm1, %v542_v12, 0 }
  0x95   : > { %1432 = vmatprep.subr.bf16.mxu1 %v1508_v3 }
  0x96   : > { %v540_v7 = vpop.permute.xlu0 %539  ;;  %v661_v9 = vpop.permute.xlu1 %660 }
  0x97   : > { %v543_v8 = vsel %vm541_vm5, %v538_v4, %v540_v7  ;;  %v554_v13 = vsel %vm206_vm1, %v540_v7, 0 }
  0x98   : > { %1360 = vmatmul.mubr.msk.bf16.vlgmr.msra.gmra.mxu0 %vm202_vm3, %v173_v63 }
  0x99   : > { %446 = vmatpush1.bf16.msra.mxu0 %v423_v5  ;;  %463 = vmatprep.mubr.bf16.mxu0 %v1510_v6 }
  0x9a   : > { %1367 = vmatprep.subr.msk.bf16.mxu0 %vm206_vm1, %v543_v8  ;;  %v663_v11 = vpop.permute.xlu0 %662  ;;  %v665_v14 = vpop.permute.xlu1 %664 }
  0x9b   : > { %1429 = vmatmul.mubr.msk.bf16.vlgmr.msra.gmra.mxu1 %vm202_vm3, %v1362_v10  ;;  %v668_v17 = vsel %vm666_vm6, %v663_v11, %v665_v14  ;;  %v667_v20 = vsel %vm666_vm6, %v661_v9, %v663_v11  ;;  %v679_v21 = vsel %vm206_vm1, %v665_v14, 0 }
  0x9c   : > { %1433 = vmatpush3.bf16.msra.mxu1 %v554_v13  ;;  %1434 = vmatprep.mubr.msk.bf16.mxu1 %vm1509_vm0, %v1508_v3  ;;  %v673_v23 = vsel %vm206_vm1, %v667_v20, 0 }
  0x9d   : > { %1438 = vmatprep.subr.bf16.mxu1 %v1508_v3 }
  0x9e   : > { %v786_v16 = vpop.permute.xlu0 %785  ;;  %v788_v18 = vpop.permute.xlu1 %787 }
  0x9f   : > { %v792_v28 = vsel %vm791_vm7, %v786_v16, %v788_v18 }
  0xa0   : > { %1364 = vmatmul.mubr.msk.bf16.vlgmr.msra.gmra.mxu0 %vm202_vm3, %v1362_v10  ;;  %v798_v31 = vsel %vm206_vm1, %v792_v28, 0 }
  0xa1   : > { %571 = vmatpush1.bf16.msra.mxu0 %v548_v15  ;;  %588 = vmatprep.mubr.bf16.mxu0 %v1510_v6 }
  0xa2   : > { %1371 = vmatprep.subr.msk.bf16.mxu0 %vm206_vm1, %v668_v17  ;;  %v790_v22 = vpop.permute.xlu0 %789  ;;  %v911_v24 = vpop.permute.xlu1 %910 }
  0xa3   : > { %1435 = vmatmul.mubr.msk.bf16.vlgmr.msra.gmra.mxu1 %vm202_vm3, %v1366_v19  ;;  %v793_v25 = vsel %vm791_vm7, %v788_v18, %v790_v22  ;;  %v804_v29 = vsel %vm206_vm1, %v790_v22, 0 }
  0xa4   : > { %1439 = vmatpush3.bf16.msra.mxu1 %v679_v21  ;;  %1440 = vmatprep.mubr.msk.bf16.mxu1 %vm1509_vm0, %v1508_v3 }
  0xa5   : > { %1444 = vmatprep.subr.bf16.mxu1 %v1508_v3 }
  0xa6   : > { %v913_v26 = vpop.permute.xlu0 %912  ;;  %v915_v30 = vpop.permute.xlu1 %914 }
  0xa7   : > { %v918_v33 = vsel %vm916_vm8, %v913_v26, %v915_v30  ;;  %v917_v36 = vsel %vm916_vm8, %v911_v24, %v913_v26  ;;  %v929_v37 = vsel %vm206_vm1, %v915_v30, 0 }
  0xa8   : > { %1368 = vmatmul.mubr.msk.bf16.vlgmr.msra.gmra.mxu0 %vm202_vm3, %v1366_v19  ;;  %v923_v39 = vsel %vm206_vm1, %v917_v36, 0 }
  0xa9   : > { %696 = vmatpush1.bf16.msra.mxu0 %v673_v23  ;;  %713 = vmatprep.mubr.bf16.mxu0 %v1510_v6 }
  0xaa   : > { %1375 = vmatprep.subr.msk.bf16.mxu0 %vm206_vm1, %v793_v25  ;;  %v1036_v32 = vpop.permute.xlu0 %1035  ;;  %v1038_v34 = vpop.permute.xlu1 %1037 }
  0xab   : > { %1441 = vmatmul.mubr.msk.bf16.vlgmr.msra.gmra.mxu1 %vm202_vm3, %v1370_v27  ;;  %v1042_v43 = vsel %vm1041_vm9, %v1036_v32, %v1038_v34 }
  0xac   : > { %1445 = vmatpush3.bf16.msra.mxu1 %v804_v29  ;;  %1446 = vmatprep.mubr.msk.bf16.mxu1 %vm1509_vm0, %v1508_v3  ;;  %v1048_v47 = vsel %vm206_vm1, %v1042_v43, 0 }
  0xad   : > { %1450 = vmatprep.subr.bf16.mxu1 %v1508_v3 }
  0xae   : > { %v1040_v38 = vpop.permute.xlu0 %1039  ;;  %v1161_v40 = vpop.permute.xlu1 %1160 }
  0xaf   : > { %v1043_v41 = vsel %vm1041_vm9, %v1038_v34, %v1040_v38  ;;  %v1054_v44 = vsel %vm206_vm1, %v1040_v38, 0 }
  0xb0   : > { %1372 = vmatmul.mubr.msk.bf16.vlgmr.msra.gmra.mxu0 %vm202_vm3, %v1370_v27 }
  0xb1   : > { %821 = vmatpush1.bf16.msra.mxu0 %v798_v31  ;;  %838 = vmatprep.mubr.bf16.mxu0 %v1510_v6 }
  0xb2   : > { %1379 = vmatprep.subr.msk.bf16.mxu0 %vm206_vm1, %v918_v33  ;;  %v1163_v45 = vpop.permute.xlu0 %1162  ;;  %v1165_v46 = vpop.permute.xlu1 %1164 }
  0xb3   : > { %1447 = vmatmul.mubr.msk.bf16.vlgmr.msra.gmra.mxu1 %vm202_vm3, %v1374_v35  ;;  %v1168_v48 = vsel %vm1166_vm10, %v1163_v45, %v1165_v46  ;;  %v1167_v50 = vsel %vm1166_vm10, %v1161_v40, %v1163_v45  ;;  %v1179_v51 = vsel %vm206_vm1, %v1165_v46, 0 }
  0xb4   : > { %1451 = vmatpush3.bf16.msra.mxu1 %v929_v37  ;;  %1452 = vmatprep.mubr.msk.bf16.mxu1 %vm1509_vm0, %v1508_v3  ;;  %v1173_v52 = vsel %vm206_vm1, %v1167_v50, 0 }
  0xb5   : > { %1456 = vmatprep.subr.bf16.mxu1 %v1508_v3 }
  0xb8   : > { %1376 = vmatmul.mubr.msk.bf16.vlgmr.msra.gmra.mxu0 %vm202_vm3, %v1374_v35 }
  0xb9   : > { %946 = vmatpush1.bf16.msra.mxu0 %v923_v39  ;;  %963 = vmatprep.mubr.bf16.mxu0 %v1510_v6 }
  0xba   : > { %1383 = vmatprep.subr.msk.bf16.mxu0 %vm206_vm1, %v1043_v41 }
  0xbb   : > { %1453 = vmatmul.mubr.msk.bf16.vlgmr.msra.gmra.mxu1 %vm202_vm3, %v1378_v42 }
  0xbc   : > { %1457 = vmatpush3.bf16.msra.mxu1 %v1054_v44  ;;  %1458 = vmatprep.mubr.msk.bf16.mxu1 %vm1509_vm0, %v1508_v3 }
  0xbd   : > { %1462 = vmatprep.subr.bf16.mxu1 %v1508_v3 }
  0xc0   : > { %1380 = vmatmul.mubr.msk.bf16.vlgmr.msra.gmra.mxu0 %vm202_vm3, %v1378_v42 }
  0xc1   : > { %1071 = vmatpush1.bf16.msra.mxu0 %v1048_v47  ;;  %1088 = vmatprep.mubr.bf16.mxu0 %v1510_v6 }
  0xc2   : > { %1387 = vmatprep.subr.msk.bf16.mxu0 %vm206_vm1, %v1168_v48 }
  0xc3   : > { %1459 = vmatmul.mubr.msk.bf16.vlgmr.msra.gmra.mxu1 %vm202_vm3, %v1382_v49 }
  0xc4   : > { %1463 = vmatpush3.bf16.msra.mxu1 %v1179_v51  ;;  %1464 = vmatprep.mubr.msk.bf16.mxu1 %vm1509_vm0, %v1508_v3 }
  0xc8   : > { %1384 = vmatmul.mubr.msk.bf16.vlgmr.msra.gmra.mxu0 %vm202_vm3, %v1382_v49 }
  0xc9   : > { %1196 = vmatpush1.bf16.msra.mxu0 %v1173_v52  ;;  %1213 = vmatprep.mubr.bf16.mxu0 %v1510_v6 }
  0xcb   : > { %1465 = vmatmul.mubr.msk.bf16.vlgmr.msra.gmra.mxu1 %vm202_vm3, %v1386_v53 }
  0xd0   : > { %1388 = vmatmul.mubr.msk.bf16.vlgmr.msra.gmra.mxu0 %vm202_vm3, %v1386_v53 }
 0x14b   : > { %v291_v54 = vpop.f32.mrf.mxu1 }
 0x14d   : > { %v1418_v55 = vpop.f32.mrf.mxu1 }
 0x14f   : > { %v294_v57 = vpop.f32.mrf.mxu1 }
 0x150   : > { %v250_v56 = vpop.f32.mrf.mxu0 }
 0x151   : > { %v1419_v59 = vpop.f32.mrf.mxu1 }
 0x152   : > { %v252_v58 = vpop.f32.mrf.mxu0 }
 0x153   : > { %v384_v60 = vpop.f32.mrf.mxu1 }
 0x154   : > { %v254_v3 = vpop.f32.mrf.mxu0  ;;  %v385_v40 = vadd.f32 %v384_v60, %v291_v54 }
 0x155   : > { %v1424_v62 = vpop.f32.mrf.mxu1 }
 0x156   : > { %v255_v61 = vpop.f32.mrf.mxu0 }
 0x157   : > { %v387_v6 = vpop.f32.mrf.mxu1 }
 0x158   : > { %v343_v63 = vpop.f32.mrf.mxu0 }
 0x159   : > { %v1425_v1 = vpop.f32.mrf.mxu1  ;;  %v344_v45 = vadd.f32 %v343_v63, %v250_v56 }
 0x15a   : > { %v345_v0 = vpop.f32.mrf.mxu0 }
 0x15b   : > { %v506_v4 = vpop.f32.mrf.mxu1  ;;  %v346_v49 = vadd.f32 %v345_v0, %v252_v58 }
 0x15c   : > { %v347_v2 = vpop.f32.mrf.mxu0  ;;  %v514_v43 = vadd.f32 %v506_v4, %v385_v40 }
 0x15d   : > { %v1430_v7 = vpop.f32.mrf.mxu1 }
 0x15e   : > { %v348_v5 = vpop.f32.mrf.mxu0 }
 0x15f   : > { %v509_v9 = vpop.f32.mrf.mxu1 }
 0x160   : > { %v465_v8 = vpop.f32.mrf.mxu0 }
 0x161   : > { %v1431_v11 = vpop.f32.mrf.mxu1  ;;  %v512_v50 = vadd.f32 %v465_v8, %v344_v45  ;;  %v1269_v8 = vpop.permute.xlu0 %1268 }
 0x162   : > { %v467_v10 = vpop.f32.mrf.mxu0 }
 0x163   : > { %v631_v13 = vpop.f32.mrf.mxu1  ;;  %v513_v55 = vadd.f32 %v467_v10, %v346_v49 }
 0x164   : > { %v469_v12 = vpop.f32.mrf.mxu0  ;;  %v639_v47 = vadd.f32 %v631_v13, %v514_v43 }
 0x165   : > { %v1436_v15 = vpop.f32.mrf.mxu1 }
 0x166   : > { %v470_v14 = vpop.f32.mrf.mxu0 }
 0x167   : > { %v634_v17 = vpop.f32.mrf.mxu1 }
 0x168   : > { %v590_v16 = vpop.f32.mrf.mxu0 }
 0x169   : > { %v1437_v19 = vpop.f32.mrf.mxu1  ;;  %v637_v57 = vadd.f32 %v590_v16, %v512_v50 }
 0x16a   : > { %v592_v18 = vpop.f32.mrf.mxu0 }
 0x16b   : > { %v756_v21 = vpop.f32.mrf.mxu1  ;;  %v638_v62 = vadd.f32 %v592_v18, %v513_v55 }
 0x16c   : > { %v594_v20 = vpop.f32.mrf.mxu0  ;;  %v764_v52 = vadd.f32 %v756_v21, %v639_v47 }
 0x16d   : > { %v1442_v23 = vpop.f32.mrf.mxu1 }
 0x16e   : > { %v595_v22 = vpop.f32.mrf.mxu0 }
 0x16f   : > { %v759_v25 = vpop.f32.mrf.mxu1 }
 0x170   : > { %v715_v24 = vpop.f32.mrf.mxu0 }
 0x171   : > { %v1443_v27 = vpop.f32.mrf.mxu1  ;;  %v762_v54 = vadd.f32 %v715_v24, %v637_v57 }
 0x172   : > { %v717_v26 = vpop.f32.mrf.mxu0 }
 0x173   : > { %v881_v29 = vpop.f32.mrf.mxu1  ;;  %v763_v56 = vadd.f32 %v717_v26, %v638_v62 }
 0x174   : > { %v719_v28 = vpop.f32.mrf.mxu0  ;;  %v889_v3 = vadd.f32 %v881_v29, %v764_v52 }
 0x175   : > { %v1448_v31 = vpop.f32.mrf.mxu1 }
 0x176   : > { %v720_v30 = vpop.f32.mrf.mxu0 }
 0x177   : > { %v884_v33 = vpop.f32.mrf.mxu1 }
 0x178   : > { %v840_v32 = vpop.f32.mrf.mxu0 }
 0x179   : > { %v1449_v35 = vpop.f32.mrf.mxu1  ;;  %v887_v63 = vadd.f32 %v840_v32, %v762_v54 }
 0x17a   : > { %v842_v34 = vpop.f32.mrf.mxu0 }
 0x17b   : > { %v1006_v37 = vpop.f32.mrf.mxu1  ;;  %v888_v0 = vadd.f32 %v842_v34, %v763_v56 }
 0x17c   : > { %v844_v36 = vpop.f32.mrf.mxu0  ;;  %v1014_v6 = vadd.f32 %v1006_v37, %v889_v3 }
 0x17d   : > { %v1454_v39 = vpop.f32.mrf.mxu1 }
 0x17e   : > { %v845_v38 = vpop.f32.mrf.mxu0 }
 0x17f   : > { %v1009_v42 = vpop.f32.mrf.mxu1 }
 0x180   : > { %v965_v41 = vpop.f32.mrf.mxu0 }
 0x181   : > { %v1455_v46 = vpop.f32.mrf.mxu1  ;;  %v1012_v5 = vadd.f32 %v965_v41, %v887_v63 }
 0x182   : > { %v967_v44 = vpop.f32.mrf.mxu0 }
 0x183   : > { %v1131_v51 = vpop.f32.mrf.mxu1  ;;  %v1013_v11 = vadd.f32 %v967_v44, %v888_v0 }
 0x184   : > { %v969_v48 = vpop.f32.mrf.mxu0  ;;  %v1139_v4 = vadd.f32 %v1131_v51, %v1014_v6 }
 0x185   : > { %v1460_v59 = vpop.f32.mrf.mxu1 }
 0x186   : > { %v970_v53 = vpop.f32.mrf.mxu0 }
 0x187   : > { %v1134_v60 = vpop.f32.mrf.mxu1 }
 0x188   : > { %v1090_v61 = vpop.f32.mrf.mxu0 }
 0x189   : > { %v1461_v2 = vpop.f32.mrf.mxu1  ;;  %v1137_v12 = vadd.f32 %v1090_v61, %v1012_v5 }
 0x18a   : > { %v1092_v1 = vpop.f32.mrf.mxu0 }
 0x18b   : > { %v1256_v7 = vpop.f32.mrf.mxu1  ;;  %v1138_v16 = vadd.f32 %v1092_v1, %v1013_v11 }
 0x18c   : > { %v1094_v58 = vpop.f32.mrf.mxu0  ;;  %v1264_v9 = vadd.f32 %v1256_v7, %v1139_v4 }
 0x18d   : > { %v1466_v13 = vpop.f32.mrf.mxu1 }
 0x18e   : > { %v1095_v10 = vpop.f32.mrf.mxu0  ;;  %v1273_v14 = vadd.f32 %v1269_v8, %v1264_v9 }
 0x18f   : > { %v1259_v18 = vpop.f32.mrf.mxu1 }
 0x190   : > { %v1215_v15 = vpop.f32.mrf.mxu0  ;;  %v1276_v19 = vmax.f32 %v1273_v14, 0.0 }
 0x191   : > { %v1262_v17 = vadd.f32 %v1215_v15, %v1137_v12  ;;  %v1467_v23 = vpop.f32.mrf.mxu1 }
 0x192   : > { %v1217_v20 = vpop.f32.mrf.mxu0  ;;  %v1395_v24 = vpack.c.bf16 %v1276_v19, %v1276_v19 }
 0x193   : > { %v1271_v21 = vadd.f32 %v1269_v8, %v1262_v17  ;;  %v1263_v22 = vadd.f32 %v1217_v20, %v1138_v16 }
 0x194   : > { %v1219_v25 = vpop.f32.mrf.mxu0  ;;  %1292 = vst.msk [vmem:[%s170_s24 + $0x8] sm:$0xf] %vm1291_vm11, %v1395_v24 }
 0x195   : > { %v1272_v26 = vadd.f32 %v1269_v8, %v1263_v22  ;;  %v1274_v28 = vmax.f32 %v1271_v21, 0.0 }
 0x196   : > { %v1220_v27 = vpop.f32.mrf.mxu0 }
 0x197   : > { %v1275_v29 = vmax.f32 %v1272_v26, 0.0 }
 0x199   : > { %v1394_v30 = vpack.c.bf16 %v1275_v29, %v1274_v28 }
 0x19b   : > { %1290 = vst [vmem:[%s170_s24] sm:$0xff] %v1394_v30 }
 0x19c PF: > { %s13_s12 = sadd.s32 1, %s1505_s12  }
 0x19d   : > { %p10_p4 = scmp.ge.s32.totalorder %s13_s12, 4  }
 0x19f   :  { %12 = sbr.rel (!%p10_p4) target bundleno = 1 (0x1), region = 70 }

</bundles_post_ra>
